<compile_context>
chip_gen: v6e
topology: v6e:2x2x1
jax: 0.10.0
libtpu: 0.0.40
codegen_flags: <defaults>
</compile_context>

<pallas_src>
import functools

import jax
import jax.numpy as jnp
from jax.experimental import pallas as pl
from jax.experimental.pallas import tpu as pltpu


# ----------------------------------------------------------------------------
# helpers
# ----------------------------------------------------------------------------
_ROW_CAP = 1024  # max rows per grid step; ~1-2 MiB/buffer, fits all gens' VMEM


def _round_up(x, m):
    return ((x + m - 1) // m) * m


def _num_tensorcores():
    """Best-effort TensorCores-per-chip (v7x / megacore chips = 2, else 1)."""
    try:
        dev = jax.devices()[0]
        n = getattr(dev, "num_cores", None)
        if isinstance(n, int) and n > 0:
            return n
        kind = str(getattr(dev, "device_kind", "")).lower()
        if ("v7" in kind) or ("7x" in kind) or ("v4" in kind) or ("v5p" in kind):
            return 2
    except Exception:
        pass
    return 1


def _row_tile(n, num_cores=1):
    """Row-tile size for an (N, C) slab.

    - multiple of 8 (f32/bf16 sublane tile),
    - as large as possible (capped at _ROW_CAP) to fill the MXU M dimension
      and amortize the ~0.35us per-grid-step overhead,
    - split into >= num_cores blocks only on multi-TensorCore chips so the
      "parallel" grid axis can shard rows across cores.
    """
    n8 = _round_up(max(n, 1), 8)
    if num_cores <= 1 or n8 <= 16:
        return min(_ROW_CAP, n8)
    per_core = _round_up(pl.cdiv(n8, num_cores), 8)
    return min(_ROW_CAP, per_core)


# ----------------------------------------------------------------------------
# Pallas kernels
# ----------------------------------------------------------------------------
def _mlp_l2norm_kernel(x_ref, w1_ref, b1_ref, w2_ref, b2_ref, o_ref):
    """y = l2norm( relu(x @ w1 + b1) @ w2 + b2 ), norm over the last axis.

    x, w1, w2 are bf16 (MXU-native); accumulation and the bias/ReLU/L2-norm
    epilogue are f32.
    """
    h = jnp.dot(x_ref[...], w1_ref[...], preferred_element_type=jnp.float32)
    h = jnp.maximum(h + b1_ref[...], 0.0)
    y = jnp.dot(h.astype(jnp.bfloat16), w2_ref[...],
                preferred_element_type=jnp.float32)
    y = y + b2_ref[...]
    # Normalize(2): y / (||y||_2 + 1e-7); reciprocal goes to the EUP slot.
    norm = jnp.sqrt(jnp.sum(y * y, axis=-1, keepdims=True))
    inv = pl.reciprocal(norm + 1e-7, approx=True)
    o_ref[...] = (y * inv).astype(o_ref.dtype)


def _l2norm_kernel(x_ref, o_ref):
    x = x_ref[...].astype(jnp.float32)
    norm = jnp.sqrt(jnp.sum(x * x, axis=-1, keepdims=True))
    inv = pl.reciprocal(norm + 1e-7, approx=True)
    o_ref[...] = (x * inv).astype(o_ref.dtype)


def mlp_l2norm(x, w1, b1, w2, b2, *, num_cores=1):
    """x: (N, C) bf16 rows -> (N, nc) f32 = l2norm(relu(x @ w1 + b1) @ w2 + b2)."""
    n, c = x.shape
    nc = w1.shape[1]
    tn = _row_tile(n, num_cores)
    return pl.pallas_call(
        _mlp_l2norm_kernel,
        out_shape=jax.ShapeDtypeStruct((n, nc), jnp.float32),
        grid=(pl.cdiv(n, tn),),                         # ragged last block OK
        in_specs=[
            pl.BlockSpec((tn, c), lambda i: (i, 0)),    # row tile (bf16)
            pl.BlockSpec((c, nc), lambda i: (0, 0)),    # w1 (bf16, VMEM-resident)
            pl.BlockSpec((1, nc), lambda i: (0, 0)),    # b1 (f32)
            pl.BlockSpec((nc, nc), lambda i: (0, 0)),   # w2 (bf16, VMEM-resident)
            pl.BlockSpec((1, nc), lambda i: (0, 0)),    # b2 (f32)
        ],
        out_specs=pl.BlockSpec((tn, nc), lambda i: (i, 0)),
        compiler_params=pltpu.CompilerParams(
            dimension_semantics=("parallel",)),
    )(x, w1, b1, w2, b2)


def l2norm_rows(x, *, num_cores=1):
    """x: (N, C) -> rows L2-normalized (no MLP). Use only when C % 128 == 0."""
    n, c = x.shape
    tn = _row_tile(n, num_cores)
    return pl.pallas_call(
        _l2norm_kernel,
        out_shape=jax.ShapeDtypeStruct((n, c), x.dtype),
        grid=(pl.cdiv(n, tn),),
        in_specs=[pl.BlockSpec((tn, c), lambda i: (i, 0))],
        out_specs=pl.BlockSpec((tn, c), lambda i: (i, 0)),
        compiler_params=pltpu.CompilerParams(
            dimension_semantics=("parallel",)),
    )(x)


# ----------------------------------------------------------------------------
# Jitted glue: gather/transpose + Pallas kernel fused under one jit each
# ----------------------------------------------------------------------------
def _gather_rows_nchw(feat, patch_id):
    """Gather in NCHW (compact B*C*P writes), then transpose the small result.

    feat (B,C,H,W) -> (B*P, C); matches permute(0,2,3,1).flatten(1,2)[:, id, :].
    """
    B, C, H, W = feat.shape
    g = jnp.take(feat.reshape(B, C, H * W), patch_id, axis=2)   # (B, C, P)
    return jnp.transpose(g, (0, 2, 1)).reshape(-1, C)


@functools.partial(jax.jit, static_argnames=("num_cores",))
def _sample_mlp_l2norm(feat, patch_id, w1, b1, w2, b2, *, num_cores):
    x = _gather_rows_nchw(feat, patch_id).astype(jnp.bfloat16)
    return mlp_l2norm(x, w1, b1, w2, b2, num_cores=num_cores)


@functools.partial(jax.jit, static_argnames=("num_cores",))
def _full_mlp_l2norm(feat, w1, b1, w2, b2, *, num_cores):
    B, C, H, W = feat.shape
    x = jnp.transpose(feat, (0, 2, 3, 1)).reshape(-1, C).astype(jnp.bfloat16)
    y = mlp_l2norm(x, w1, b1, w2, b2, num_cores=num_cores)     # (B*H*W, nc)
    nc = y.shape[-1]
    return jnp.transpose(y.reshape(B, H * W, nc), (0, 2, 1)).reshape(B, nc, H, W)


@functools.partial(jax.jit, static_argnames=("num_cores",))
def _sample_l2norm_pallas(feat, patch_id, *, num_cores):
    return l2norm_rows(_gather_rows_nchw(feat, patch_id), num_cores=num_cores)


@jax.jit
def _sample_l2norm_xla(feat, patch_id):
    # C < 128 -> lane-sparse stores; cheaper fused into the gather in XLA.
    x = _gather_rows_nchw(feat, patch_id)
    norm = jnp.sqrt(jnp.sum(x * x, axis=-1, keepdims=True))
    return x / (norm + 1e-7)


@functools.partial(jax.jit, static_argnames=("num_cores",))
def _full_l2norm_pallas(feat, *, num_cores):
    B, C, H, W = feat.shape
    x = jnp.transpose(feat, (0, 2, 3, 1)).reshape(-1, C)
    y = l2norm_rows(x, num_cores=num_cores)
    return jnp.transpose(y.reshape(B, H * W, C), (0, 2, 1)).reshape(B, C, H, W)


@jax.jit
def _full_l2norm_xla(feat):
    # Channel-norm directly in NCHW: no transposes, no kernel launch.
    norm = jnp.sqrt(jnp.sum(feat * feat, axis=1, keepdims=True))
    return feat / (norm + 1e-7)


# ----------------------------------------------------------------------------
# PatchSampleF wrapper
# ----------------------------------------------------------------------------
class PatchSampleFPallas:
    """JAX/Pallas port of PatchSampleF.forward (per-feat MLP + L2 normalize)."""

    def __init__(self, use_mlp=False, nc=256, init_gain=0.02, seed=0):
        self.use_mlp = use_mlp
        self.nc = nc
        self.init_gain = init_gain
        self.mlp_init = False
        self.params = []          # per-feat (w1, b1, w2, b2); w stored (in, out)
        self._key = jax.random.PRNGKey(seed)
        self._num_cores = _num_tensorcores()

    def _create_mlp(self, feats):
        key = self._key
        for feat in feats:
            input_nc = feat.shape[1]
            key, k1, k2 = jax.random.split(key, 3)
            # nn.init.normal_(weight, 0.0, init_gain); bias = 0 ("normal" init).
            # Weights stored bf16 (MXU-native); biases stay f32 for the epilogue.
            w1 = (self.init_gain *
                  jax.random.normal(k1, (input_nc, self.nc))).astype(jnp.bfloat16)
            b1 = jnp.zeros((1, self.nc), jnp.float32)
            w2 = (self.init_gain *
                  jax.random.normal(k2, (self.nc, self.nc))).astype(jnp.bfloat16)
            b2 = jnp.zeros((1, self.nc), jnp.float32)
            self.params.append((w1, b1, w2, b2))
        self.mlp_init = True

    def forward(self, feats, num_patches=64, patch_ids=None, sample_key=None):
        # TODO(synk): mask_sampling branch (torch.nonzero over a mask gives a
        # dynamic-length index set) requires dynamic shapes and is not ported.
        return_ids, return_feats = [], []
        if self.use_mlp and not self.mlp_init:
            self._create_mlp(feats)
        if sample_key is None:
            sample_key = jax.random.PRNGKey(1234)

        for feat_id, feat in enumerate(feats):
            B, C, H, W = feat.shape
            if num_patches > 0:
                if patch_ids is not None:
                    patch_id = jnp.asarray(patch_ids[feat_id], dtype=jnp.int32)
                else:
                    # torch.randperm(H*W)[:num_patches] equivalent (host glue).
                    sample_key, sub = jax.random.split(sample_key)
                    perm = jax.random.permutation(sub, H * W)
                    patch_id = perm[: int(min(num_patches, H * W))]
                if self.use_mlp:
                    w1, b1, w2, b2 = self.params[feat_id]
                    x_sample = _sample_mlp_l2norm(
                        feat, patch_id, w1, b1, w2, b2,
                        num_cores=self._num_cores)
                elif C % 128 == 0:
                    x_sample = _sample_l2norm_pallas(
                        feat, patch_id, num_cores=self._num_cores)
                else:
                    x_sample = _sample_l2norm_xla(feat, patch_id)
            else:
                patch_id = jnp.array([], dtype=jnp.int32)
                if self.use_mlp:
                    w1, b1, w2, b2 = self.params[feat_id]
                    x_sample = _full_mlp_l2norm(
                        feat, w1, b1, w2, b2, num_cores=self._num_cores)
                elif C % 128 == 0:
                    x_sample = _full_l2norm_pallas(
                        feat, num_cores=self._num_cores)
                else:
                    x_sample = _full_l2norm_xla(feat)
            return_ids.append(patch_id)
            return_feats.append(x_sample)
        return return_feats, return_ids


# ----------------------------------------------------------------------------
# Pure-JAX references for verification
# ----------------------------------------------------------------------------
def _ref_mlp_l2norm(x, w1, b1, w2, b2):
    h = jnp.maximum(x @ w1 + b1, 0.0)
    y = h @ w2 + b2
    norm = jnp.sqrt(jnp.sum(y * y, axis=-1, keepdims=True))
    return y / (norm + 1e-7)


def _ref_l2norm(x):
    norm = jnp.sqrt(jnp.sum(x * x, axis=-1, keepdims=True))
    return x / (norm + 1e-7)


if __name__ == "__main__":
    key = jax.random.PRNGKey(0)
    k0, k1, k2 = jax.random.split(key, 3)

    # Encoder feature maps (NCHW), as the module receives a list of feats.
    feat0 = jax.random.normal(k0, (2, 4, 16, 16), dtype=jnp.float32)
    feat1 = jax.random.normal(k1, (2, 8, 8, 8), dtype=jnp.float32)
    feats = [feat0, feat1]

    NC = 256          # module default; multiple of 128 -> lane-dense output
    P = 64            # num_patches (module default)

    sampler = PatchSampleFPallas(use_mlp=True, nc=NC, init_gain=0.02, seed=0)
    out_feats, out_ids = sampler.forward(
        feats, num_patches=P, sample_key=jax.random.PRNGKey(7))
    for o in out_feats:
        jax.block_until_ready(o)

    # --- sampled + MLP path vs pure-JAX f32 reference ------------------------
    for fid, feat in enumerate(feats):
        B, C, H, W = feat.shape
        fr = jnp.transpose(feat, (0, 2, 3, 1)).reshape(B, H * W, C)
        xs = fr[:, out_ids[fid], :].reshape(-1, C)
        w1, b1, w2, b2 = (p.astype(jnp.float32) for p in sampler.params[fid])
        ref = _ref_mlp_l2norm(xs, w1, b1, w2, b2)
        n_expect = B * min(P, H * W)
        assert out_feats[fid].shape == (n_expect, NC), out_feats[fid].shape
        assert jnp.max(jnp.abs(out_feats[fid] - ref)) < 2e-2

    # --- ragged row count (N = 100, not a tile / sublane multiple) -----------
    rag_feats, rag_ids = sampler.forward(
        [feat0], num_patches=50, sample_key=jax.random.PRNGKey(3))
    jax.block_until_ready(rag_feats[0])
    fr = jnp.transpose(feat0, (0, 2, 3, 1)).reshape(2, 16 * 16, 4)
    xs = fr[:, rag_ids[0], :].reshape(-1, 4)
    w1, b1, w2, b2 = (p.astype(jnp.float32) for p in sampler.params[0])
    ref = _ref_mlp_l2norm(xs, w1, b1, w2, b2)
    assert rag_feats[0].shape == (2 * 50, NC), rag_feats[0].shape
    assert jnp.max(jnp.abs(rag_feats[0] - ref)) < 2e-2

    # --- num_patches == 0 path (full map -> (B, nc, H, W)) -------------------
    full_feats, _ = sampler.forward([feat0], num_patches=0)
    jax.block_until_ready(full_feats[0])
    assert full_feats[0].shape == (2, NC, 16, 16), full_feats[0].shape
    x_full = jnp.transpose(feat0, (0, 2, 3, 1)).reshape(-1, 4)
    ref_full = _ref_mlp_l2norm(x_full, w1, b1, w2, b2)
    ref_full = jnp.transpose(
        ref_full.reshape(2, 16 * 16, NC), (0, 2, 1)).reshape(2, NC, 16, 16)
    assert jnp.max(jnp.abs(full_feats[0] - ref_full)) < 2e-2

    # --- no-MLP path, small C (<128): fused XLA normalize --------------------
    sampler_nomlp = PatchSampleFPallas(use_mlp=False, nc=NC)
    nm_feats, nm_ids = sampler_nomlp.forward(
        [feat0], num_patches=P, sample_key=jax.random.PRNGKey(11))
    jax.block_until_ready(nm_feats[0])
    fr = jnp.transpose(feat0, (0, 2, 3, 1)).reshape(2, 16 * 16, 4)
    xs = fr[:, nm_ids[0], :].reshape(-1, 4)
    assert nm_feats[0].shape == (2 * P, 4), nm_feats[0].shape
    assert jnp.max(jnp.abs(nm_feats[0] - _ref_l2norm(xs))) < 1e-2

    # --- no-MLP path, lane-dense C (=128): Pallas l2norm kernel --------------
    feat2 = jax.random.normal(k2, (2, 128, 8, 8), dtype=jnp.float32)
    nm2_feats, nm2_ids = sampler_nomlp.forward(
        [feat2], num_patches=P, sample_key=jax.random.PRNGKey(13))
    jax.block_until_ready(nm2_feats[0])
    fr2 = jnp.transpose(feat2, (0, 2, 3, 1)).reshape(2, 64, 128)
    xs2 = fr2[:, nm2_ids[0], :].reshape(-1, 128)
    assert nm2_feats[0].shape == (2 * P, 128), nm2_feats[0].shape
    assert jnp.max(jnp.abs(nm2_feats[0] - _ref_l2norm(xs2))) < 1e-2

    print("KERNEL_OK")
</pallas_src>

<mosaic_0001>
module attributes {stable_mosaic.version = 11 : i64} {
  func.func @_mlp_l2norm_kernel(%arg0: i32, %arg1: memref<128x4xbf16, #tpu.memory_space<vmem>>, %arg2: memref<4x256xbf16, #tpu.memory_space<vmem>>, %arg3: memref<1x256xf32, #tpu.memory_space<vmem>>, %arg4: memref<256x256xbf16, #tpu.memory_space<vmem>>, %arg5: memref<1x256xf32, #tpu.memory_space<vmem>>, %arg6: memref<128x256xf32, #tpu.memory_space<vmem>>) attributes {dimension_semantics = [#tpu.dimension_semantics<parallel>], iteration_bounds = array<i64: 1>, scalar_prefetch = 0 : i64, scratch_operands = 0 : i64, tpu.core_type = #tpu.core_type<tc>, window_params = [{transform_indices = @transform_0, window_bounds = array<i64: 128, 4>}, {pipeline_mode = #tpu.pipeline_mode<synchronous>, transform_indices = @transform_1, window_bounds = array<i64: 4, 256>}, {pipeline_mode = #tpu.pipeline_mode<synchronous>, transform_indices = @transform_2, window_bounds = array<i64: 1, 256>}, {pipeline_mode = #tpu.pipeline_mode<synchronous>, transform_indices = @transform_3, window_bounds = array<i64: 256, 256>}, {pipeline_mode = #tpu.pipeline_mode<synchronous>, transform_indices = @transform_4, window_bounds = array<i64: 1, 256>}, {transform_indices = @transform_5, window_bounds = array<i64: 128, 256>}]} {
    %c0 = arith.constant 0 : index
    %c0_0 = arith.constant 0 : index
    %0 = vector.load %arg1[%c0, %c0_0] : memref<128x4xbf16, #tpu.memory_space<vmem>>, vector<128x4xbf16>
    %c0_1 = arith.constant 0 : index
    %c0_2 = arith.constant 0 : index
    %1 = vector.load %arg2[%c0_1, %c0_2] : memref<4x256xbf16, #tpu.memory_space<vmem>>, vector<4x256xbf16>
    %cst = arith.constant dense<0.000000e+00> : vector<128x256xf32>
    %2 = tpu.matmul %0, %1, %cst {dimension_numbers = #tpu.dot_dimension_numbers<[1], [0], [0], [1], [0, 0, 1, 1], [], []>} : vector<128x4xbf16>, vector<4x256xbf16>, vector<128x256xf32> -> vector<128x256xf32>
    %c0_3 = arith.constant 0 : index
    %c0_4 = arith.constant 0 : index
    %3 = vector.load %arg3[%c0_3, %c0_4] : memref<1x256xf32, #tpu.memory_space<vmem>>, vector<1x256xf32>
    %4 = vector.broadcast %3 : vector<1x256xf32> to vector<128x256xf32>
    %5 = arith.addf %2, %4 : vector<128x256xf32>
    %cst_5 = arith.constant 0.000000e+00 : f32
    %6 = vector.broadcast %cst_5 : f32 to vector<128x256xf32>
    %7 = arith.maximumf %5, %6 : vector<128x256xf32>
    %8 = arith.truncf %7 : vector<128x256xf32> to vector<128x256xbf16>
    %c0_6 = arith.constant 0 : index
    %c0_7 = arith.constant 0 : index
    %9 = vector.load %arg4[%c0_6, %c0_7] : memref<256x256xbf16, #tpu.memory_space<vmem>>, vector<256x256xbf16>
    %cst_8 = arith.constant dense<0.000000e+00> : vector<128x256xf32>
    %10 = tpu.matmul %8, %9, %cst_8 {dimension_numbers = #tpu.dot_dimension_numbers<[1], [0], [0], [1], [0, 0, 1, 1], [], []>} : vector<128x256xbf16>, vector<256x256xbf16>, vector<128x256xf32> -> vector<128x256xf32>
    %c0_9 = arith.constant 0 : index
    %c0_10 = arith.constant 0 : index
    %11 = vector.load %arg5[%c0_9, %c0_10] : memref<1x256xf32, #tpu.memory_space<vmem>>, vector<1x256xf32>
    %12 = vector.broadcast %11 : vector<1x256xf32> to vector<128x256xf32>
    %13 = arith.addf %10, %12 : vector<128x256xf32>
    %14 = arith.mulf %13, %13 : vector<128x256xf32>
    %cst_11 = arith.constant dense<0.000000e+00> : vector<128xf32>
    %15 = vector.multi_reduction <add>, %14, %cst_11 [1] : vector<128x256xf32> to vector<128xf32>
    %16 = vector.shape_cast %15 : vector<128xf32> to vector<128x1xf32>
    %17 = math.sqrt %16 : vector<128x1xf32>
    %cst_12 = arith.constant 1.000000e-07 : f32
    %18 = vector.broadcast %cst_12 : f32 to vector<128x1xf32>
    %19 = arith.addf %17, %18 : vector<128x1xf32>
    %20 = tpu.reciprocal %19 {approx = true} : vector<128x1xf32> -> vector<128x1xf32>
    %21 = vector.broadcast %20 : vector<128x1xf32> to vector<128x256xf32>
    %22 = arith.mulf %13, %21 : vector<128x256xf32>
    %c0_13 = arith.constant 0 : index
    %c0_14 = arith.constant 0 : index
    %23 = vector.load %arg6[%c0_13, %c0_14] : memref<128x256xf32, #tpu.memory_space<vmem>>, vector<128x256xf32>
    tpu.vector_store %arg6[%c0_13, %c0_14], %22 {strides = array<i32>} : memref<128x256xf32, #tpu.memory_space<vmem>>, vector<128x256xf32>,
    return
  }
  func.func @transform_0(%arg0: i32) -> (i32, i32) {
    %c0_i32 = arith.constant 0 : i32
    %c0_i32_0 = arith.constant 0 : i32
    return %arg0, %c0_i32 : i32, i32
  }
  func.func @transform_1(%arg0: i32) -> (i32, i32) {
    %c0_i32 = arith.constant 0 : i32
    %c0_i32_0 = arith.constant 0 : i32
    %c0_i32_1 = arith.constant 0 : i32
    return %c0_i32, %c0_i32_0 : i32, i32
  }
  func.func @transform_2(%arg0: i32) -> (i32, i32) {
    %c0_i32 = arith.constant 0 : i32
    %c0_i32_0 = arith.constant 0 : i32
    %c0_i32_1 = arith.constant 0 : i32
    return %c0_i32, %c0_i32_0 : i32, i32
  }
  func.func @transform_3(%arg0: i32) -> (i32, i32) {
    %c0_i32 = arith.constant 0 : i32
    %c0_i32_0 = arith.constant 0 : i32
    %c0_i32_1 = arith.constant 0 : i32
    return %c0_i32, %c0_i32_0 : i32, i32
  }
  func.func @transform_4(%arg0: i32) -> (i32, i32) {
    %c0_i32 = arith.constant 0 : i32
    %c0_i32_0 = arith.constant 0 : i32
    %c0_i32_1 = arith.constant 0 : i32
    return %c0_i32, %c0_i32_0 : i32, i32
  }
  func.func @transform_5(%arg0: i32) -> (i32, i32) {
    %c0_i32 = arith.constant 0 : i32
    %c0_i32_0 = arith.constant 0 : i32
    return %arg0, %c0_i32 : i32, i32
  }
}

</mosaic_0001>

<bundles_post_ra>
// kernel: _sample_mlp_l2norm.1
= control target key start
LH: loop header
LB: loop body
LE: loop exit
PB: predicated region body
PF: predicated region fallthrough
CT: control target
= control target key end

     0   :  { %vm125_vm0 = vcmask 1041408   ;;  %v1142_v3 = vmov 0   ;;  %vm100_vm1 = vcmask 31744   ;;  %s1648_s0 = inlined_call_operand.vmem [shape: bf16[128,4], index: 0, kind: input, shape index: {}]   ;;  %s1649_s1 = inlined_call_operand.vmem [shape: bf16[4,256], index: 1, kind: input, shape index: {}]   ;;  %s1650_s2 = inlined_call_operand.vmem [shape: f32[1,256], index: 2, kind: input, shape index: {}]   ;;  %s1651_s3 = inlined_call_operand.vmem [shape: bf16[256,256], index: 3, kind: input, shape index: {}]   ;;  %s1652_s4 = inlined_call_operand.vmem [shape: f32[1,256], index: 4, kind: input, shape index: {}]   ;;  %s1653_s5 = inlined_call_operand.hbm [shape: f32[128,256], index: 5, kind: output, shape index: {}]  }
   0x1   :  { %v922_v0 = vld.sshfl [vmem:[%s1649_s1] sm:$0x33 pattern:$0x76325410]  ;;  %164 = vmatprep.mubr.bf16.mxu0 %v1142_v3  ;;  %v1008_v5 = vld [vmem:[%s1651_s3 + $0x70] ss:$8 sps:$4 sm:$0xff]  }
   0x2   :  { %v99_v1 = vcombine.high %v922_v0, %v922_v0  ;;  %v127_v2 = vsel %vm125_vm0, %v922_v0, 0  ;;  %v1000_v4 = vld [vmem:[%s1648_s0] sm:$0xff]   ;;  %v1010_v6 = vld [vmem:[%s1651_s3 + $0x74] ss:$8 sps:$4 sm:$0xff]   ;;  %v1001_v7 = vld [vmem:[%s1648_s0 + $0x8] sm:$0xff]  }
   0x3   :  { %v1013_v8 = vld [vmem:[%s1651_s3 + $0x64] ss:$8 sps:$4 sm:$0xff]   ;;  %964 = vmatprep.subr.bf16.mxu1 %v1010_v6  ;;  %v1011_v9 = vld [vmem:[%s1651_s3 + $0x60] ss:$8 sps:$4 sm:$0xff]   ;;  %v1016_v10 = vld [vmem:[%s1651_s3 + $0x54] ss:$8 sps:$4 sm:$0xff]  }
   0x4   :  { %923 = vmatprep.subr.msk.bf16.mxu0 %vm125_vm0, %v99_v1  ;;  %980 = vmatpush1.bf16.msra.mxu1 %v1008_v5  ;;  %v1014_v11 = vld [vmem:[%s1651_s3 + $0x50] ss:$8 sps:$4 sm:$0xff]   ;;  %v1019_v12 = vld [vmem:[%s1651_s3 + $0x44] ss:$8 sps:$4 sm:$0xff]   ;;  %v1017_v14 = vld [vmem:[%s1651_s3 + $0x40] ss:$8 sps:$4 sm:$0xff]  }
   0x5   :  { %147 = vmatpush1.bf16.msra.mxu0 %v127_v2  ;;  %965 = vmatprep.subr.bf16.mxu1 %v1013_v8  ;;  %v1002_v13 = vld [vmem:[%s1648_s0 + $0x10] sm:$0xff]   ;;  %v1003_v17 = vld [vmem:[%s1648_s0 + $0x18] sm:$0xff]   ;;  %v1025_v18 = vld [vmem:[%s1651_s3 + $0x24] ss:$8 sps:$4 sm:$0xff]  }
   0x6   :  { %497 = vmatprep.subr.bf16.mxu0 %v1010_v6  ;;  %v1022_v15 = vld [vmem:[%s1651_s3 + $0x34] ss:$8 sps:$4 sm:$0xff]   ;;  %v1020_v16 = vld [vmem:[%s1651_s3 + $0x30] ss:$8 sps:$4 sm:$0xff]  }
   0x8   :  { %924 = vmatmul.mubr.msk.bf16.vlgmr.msra.gmra.mxu0 %vm100_vm1, %v1000_v4  ;;  %981 = vmatpush1.bf16.msra.mxu1 %v1011_v9 }
   0x9   :  { %174 = vmatprep.mubr.bf16.mxu0 %v1142_v3  ;;  %498 = vmatpush1.bf16.msra.mxu0 %v1008_v5 }
   0xa   :  { %499 = vmatprep.subr.bf16.mxu0 %v1013_v8  ;;  %966 = vmatprep.subr.bf16.mxu1 %v1016_v10 }
   0xc   :  { %982 = vmatpush1.bf16.msra.mxu1 %v1014_v11 }
   0xd   :  { %500 = vmatpush1.bf16.msra.mxu0 %v1011_v9  ;;  %967 = vmatprep.subr.bf16.mxu1 %v1019_v12 }
   0xe   :  { %501 = vmatprep.subr.bf16.mxu0 %v1016_v10 }
  0x10   :  { %925 = vmatmul.mubr.msk.bf16.gmra.mxu0 %vm100_vm1, %v1001_v7  ;;  %983 = vmatpush1.bf16.msra.mxu1 %v1017_v14 }
  0x11   :  { %184 = vmatprep.mubr.bf16.mxu0 %v1142_v3  ;;  %502 = vmatpush1.bf16.msra.mxu0 %v1014_v11 }
  0x12   :  { %503 = vmatprep.subr.bf16.mxu0 %v1019_v12  ;;  %968 = vmatprep.subr.bf16.mxu1 %v1022_v15 }
  0x15   :  { %504 = vmatpush1.bf16.msra.mxu0 %v1017_v14 }
  0x16   :  { %505 = vmatprep.subr.bf16.mxu0 %v1022_v15 }
  0x18   :  { %926 = vmatmul.mubr.msk.bf16.gmra.mxu0 %vm100_vm1, %v1002_v13 }
  0x19   :  { %194 = vmatprep.mubr.bf16.mxu0 %v1142_v3 }
  0x1a   :  { %10 = vsyncpa [#allocation3], 0  ;;  %506 = vmatpush1.bf16.msra.mxu0 %v1020_v16  ;;  %v1023_v19 = vld [vmem:[%s1651_s3 + $0x20] ss:$8 sps:$4 sm:$0xff]   ;;  %984 = vmatpush1.bf16.msra.mxu1 %v1020_v16  ;;  %v1028_v20 = vld [vmem:[%s1651_s3 + $0x14] ss:$8 sps:$4 sm:$0xff]   ;;  %v41_v44 = vlaneseq }
  0x1b   :  { %507 = vmatprep.subr.bf16.mxu0 %v1025_v18  ;;  %969 = vmatprep.subr.bf16.mxu1 %v1025_v18  ;;  %v1026_v21 = vld [vmem:[%s1651_s3 + $0x10] ss:$8 sps:$4 sm:$0xff]   ;;  %v1031_v22 = vld [vmem:[%s1651_s3 + $0x4] ss:$8 sps:$4 sm:$0xff]   ;;  %v1029_v24 = vld [vmem:[%s1651_s3] ss:$8 sps:$4 sm:$0xff]  }
  0x1c   :  { %v1004_v23 = vld [vmem:[%s1648_s0 + $0x20] sm:$0xff]   ;;  %v1034_v25 = vld [vmem:[%s1651_s3 + $0xf4] ss:$8 sps:$4 sm:$0xff]   ;;  %v1032_v26 = vld [vmem:[%s1651_s3 + $0xf0] ss:$8 sps:$4 sm:$0xff]   ;;  %v1315_v45 = vshrl.u32 %v41_v44, 7 }
  0x1d   :  { %v1037_v27 = vld [vmem:[%s1651_s3 + $0xe4] ss:$8 sps:$4 sm:$0xff]   ;;  %v1035_v29 = vld [vmem:[%s1651_s3 + $0xe0] ss:$8 sps:$4 sm:$0xff]   ;;  %v1040_v30 = vld [vmem:[%s1651_s3 + $0xd4] ss:$8 sps:$4 sm:$0xff]  }
  0x1e   :  { %508 = vmatpush1.bf16.msra.mxu0 %v1023_v19  ;;  %985 = vmatpush1.bf16.msra.mxu1 %v1023_v19  ;;  %v1005_v28 = vld [vmem:[%s1648_s0 + $0x28] sm:$0xff]   ;;  %v1038_v31 = vld [vmem:[%s1651_s3 + $0xd0] ss:$8 sps:$4 sm:$0xff]   ;;  %v1046_v35 = vld [vmem:[%s1651_s3 + $0xb4] ss:$8 sps:$4 sm:$0xff]   ;;  %v47_v46 = vsub.s32 1, %v1315_v45 }
  0x1f   :  { %509 = vmatprep.subr.bf16.mxu0 %v1028_v20  ;;  %970 = vmatprep.subr.bf16.mxu1 %v1028_v20  ;;  %v1043_v32 = vld [vmem:[%s1651_s3 + $0xc4] ss:$8 sps:$4 sm:$0xff]   ;;  %v1006_v33 = vld [vmem:[%s1648_s0 + $0x30] sm:$0xff]   ;;  %v1041_v34 = vld [vmem:[%s1651_s3 + $0xc0] ss:$8 sps:$4 sm:$0xff]   ;;  %v43_v47 = vsub.s32 0, %v1315_v45 }
  0x20   :  { %927 = vmatmul.mubr.msk.bf16.gmra.mxu0 %vm100_vm1, %v1003_v17  ;;  %v1044_v36 = vld [vmem:[%s1651_s3 + $0xb0] ss:$8 sps:$4 sm:$0xff]   ;;  %v1049_v38 = vld [vmem:[%s1651_s3 + $0xa4] ss:$8 sps:$4 sm:$0xff]   ;;  %v1047_v39 = vld [vmem:[%s1651_s3 + $0xa0] ss:$8 sps:$4 sm:$0xff]  }
  0x21   :  { %204 = vmatprep.mubr.bf16.mxu0 %v1142_v3  ;;  %v1007_v37 = vld [vmem:[%s1648_s0 + $0x38] sm:$0xff]   ;;  %v1055_v42 = vld [vmem:[%s1651_s3 + $0x84] ss:$8 sps:$4 sm:$0xff]   ;;  %v1053_v43 = vld [vmem:[%s1651_s3 + $0x80] ss:$8 sps:$4 sm:$0xff]  }
  0x22   :  { %510 = vmatpush1.bf16.msra.mxu0 %v1026_v21  ;;  %986 = vmatpush1.bf16.msra.mxu1 %v1026_v21  ;;  %v1052_v40 = vld [vmem:[%s1651_s3 + $0x94] ss:$8 sps:$4 sm:$0xff]   ;;  %v1050_v41 = vld [vmem:[%s1651_s3 + $0x90] ss:$8 sps:$4 sm:$0xff]   ;;  %v39_v48 = vld [vmem:[%s1650_s2] sm:$0x3] }
  0x23   :  { %511 = vmatprep.subr.bf16.mxu0 %v1031_v22  ;;  %971 = vmatprep.subr.bf16.mxu1 %v1031_v22  ;;  %v1324_v50 = vrot.slane %v39_v48, %v47_v46  ;;  %v1328_v51 = vrot.slane %v39_v48, %v43_v47 }
  0x26   :  { %512 = vmatpush1.bf16.msra.mxu0 %v1029_v24  ;;  %987 = vmatpush1.bf16.msra.mxu1 %v1029_v24 }
  0x27   :  { %513 = vmatprep.subr.bf16.mxu0 %v1034_v25  ;;  %972 = vmatprep.subr.bf16.mxu1 %v1034_v25 }
  0x28   :  { %928 = vmatmul.mubr.msk.bf16.gmra.mxu0 %vm100_vm1, %v1004_v23 }
  0x29   :  { %214 = vmatprep.mubr.bf16.mxu0 %v1142_v3 }
  0x2a   :  { %514 = vmatpush2.bf16.msra.mxu0 %v1032_v26  ;;  %988 = vmatpush2.bf16.msra.mxu1 %v1032_v26 }
  0x2b   :  { %515 = vmatprep.subr.bf16.mxu0 %v1037_v27  ;;  %973 = vmatprep.subr.bf16.mxu1 %v1037_v27 }
  0x2e   :  { %516 = vmatpush2.bf16.msra.mxu0 %v1035_v29  ;;  %989 = vmatpush2.bf16.msra.mxu1 %v1035_v29 }
  0x2f   :  { %517 = vmatprep.subr.bf16.mxu0 %v1040_v30  ;;  %974 = vmatprep.subr.bf16.mxu1 %v1040_v30 }
  0x30   :  { %929 = vmatmul.mubr.msk.bf16.gmra.mxu0 %vm100_vm1, %v1005_v28 }
  0x31   :  { %224 = vmatprep.mubr.bf16.mxu0 %v1142_v3 }
  0x32   :  { %518 = vmatpush2.bf16.msra.mxu0 %v1038_v31  ;;  %990 = vmatpush2.bf16.msra.mxu1 %v1038_v31 }
  0x33   :  { %519 = vmatprep.subr.bf16.mxu0 %v1043_v32  ;;  %975 = vmatprep.subr.bf16.mxu1 %v1043_v32 }
  0x36   :  { %520 = vmatpush2.bf16.msra.mxu0 %v1041_v34  ;;  %991 = vmatpush2.bf16.msra.mxu1 %v1041_v34 }
  0x37   :  { %521 = vmatprep.subr.bf16.mxu0 %v1046_v35  ;;  %976 = vmatprep.subr.bf16.mxu1 %v1046_v35 }
  0x38   :  { %930 = vmatmul.mubr.msk.bf16.gmra.mxu0 %vm100_vm1, %v1006_v33 }
  0x39   :  { %234 = vmatprep.mubr.bf16.mxu0 %v1142_v3 }
  0x3a   :  { %522 = vmatpush2.bf16.msra.mxu0 %v1044_v36  ;;  %992 = vmatpush2.bf16.msra.mxu1 %v1044_v36 }
  0x3b   :  { %523 = vmatprep.subr.bf16.mxu0 %v1049_v38  ;;  %977 = vmatprep.subr.bf16.mxu1 %v1049_v38 }
  0x3e   :  { %524 = vmatpush2.bf16.msra.mxu0 %v1047_v39  ;;  %993 = vmatpush2.bf16.msra.mxu1 %v1047_v39 }
  0x3f   :  { %525 = vmatprep.subr.bf16.mxu0 %v1052_v40  ;;  %978 = vmatprep.subr.bf16.mxu1 %v1052_v40 }
  0x40   :  { %931 = vmatmul.mubr.msk.bf16.gmra.mxu0 %vm100_vm1, %v1007_v37 }
  0x42   :  { %526 = vmatpush2.bf16.msra.mxu0 %v1050_v41  ;;  %994 = vmatpush2.bf16.msra.mxu1 %v1050_v41 }
  0x43   :  { %527 = vmatprep.subr.bf16.mxu0 %v1055_v42  ;;  %979 = vmatprep.subr.bf16.mxu1 %v1055_v42 }
  0x46   :  { %528 = vmatpush2.bf16.msra.mxu0 %v1053_v43  ;;  %995 = vmatpush2.bf16.msra.mxu1 %v1053_v43 }
  0xc8   :  { %v166_v49 = vpop.f32.mrf.mxu0 }
  0xc9   :  { %v167_v56 = vadd.f32 %v166_v49, %v1328_v51 }
  0xca   :  { %v168_v52 = vpop.f32.mrf.mxu0 }
  0xcb   :  { %v169_v54 = vadd.f32 %v168_v52, %v1324_v50  ;;  %v245_v63 = vmax.f32 %v167_v56, 0.0 }
  0xcc   :  { %v170_v53 = vpop.f32.mrf.mxu0 }
  0xcd   :  { %v171_v55 = vadd.f32 %v170_v53, %v1328_v51  ;;  %v246_v61 = vmax.f32 %v169_v54, 0.0 }
  0xce   :  { %v172_v57 = vpop.f32.mrf.mxu0 }
  0xcf   :  { %v173_v58 = vadd.f32 %v172_v57, %v1324_v50  ;;  %v247_v59 = vmax.f32 %v171_v55, 0.0 }
  0xd0   :  { %v176_v60 = vpop.f32.mrf.mxu0 }
  0xd1   :  { %v248_v62 = vmax.f32 %v173_v58, 0.0  ;;  %v277_v2 = vpack.c.bf16 %v247_v59, %v245_v63  ;;  %v177_v6 = vadd.f32 %v176_v60, %v1328_v51 }
  0xd2   :  { %v178_v0 = vpop.f32.mrf.mxu0 }
  0xd3   :  { %v278_v1 = vpack.c.bf16 %v248_v62, %v246_v61  ;;  %v179_v4 = vadd.f32 %v178_v0, %v1324_v50  ;;  %v249_v13 = vmax.f32 %v177_v6, 0.0 }
  0xd4   :  { %v180_v3 = vpop.f32.mrf.mxu0 }
  0xd5   :  { %v181_v5 = vadd.f32 %v180_v3, %v1328_v51  ;;  %529 = vmatprep.mubr.bf16.mxu0 %v278_v1  ;;  %v250_v11 = vmax.f32 %v179_v4, 0.0 }
  0xd6   :  { %v182_v7 = vpop.f32.mrf.mxu0  ;;  %530 = vmatmul.mubr.bf16.vlgmr.msra.gmra.mxu0 %v277_v2 }
  0xd7   :  { %v183_v8 = vadd.f32 %v182_v7, %v1324_v50  ;;  %v251_v9 = vmax.f32 %v181_v5, 0.0 }
  0xd8   :  { %v186_v10 = vpop.f32.mrf.mxu0 }
  0xd9   :  { %v252_v12 = vmax.f32 %v183_v8, 0.0  ;;  %v279_v16 = vpack.c.bf16 %v251_v9, %v249_v13  ;;  %v187_v20 = vadd.f32 %v186_v10, %v1328_v51 }
  0xda   :  { %v188_v14 = vpop.f32.mrf.mxu0 }
  0xdb   :  { %v280_v15 = vpack.c.bf16 %v252_v12, %v250_v11  ;;  %v189_v18 = vadd.f32 %v188_v14, %v1324_v50  ;;  %v253_v27 = vmax.f32 %v187_v20, 0.0 }
  0xdc   :  { %v190_v17 = vpop.f32.mrf.mxu0 }
  0xdd   :  { %v191_v19 = vadd.f32 %v190_v17, %v1328_v51  ;;  %539 = vmatprep.mubr.bf16.mxu0 %v280_v15  ;;  %v254_v25 = vmax.f32 %v189_v18, 0.0 }
  0xde   :  { %v192_v21 = vpop.f32.mrf.mxu0  ;;  %540 = vmatmul.mubr.bf16.gmra.mxu0 %v279_v16 }
  0xdf   :  { %v193_v22 = vadd.f32 %v192_v21, %v1324_v50  ;;  %v255_v23 = vmax.f32 %v191_v19, 0.0 }
  0xe0   :  { %v196_v24 = vpop.f32.mrf.mxu0 }
  0xe1   :  { %v256_v26 = vmax.f32 %v193_v22, 0.0  ;;  %v281_v30 = vpack.c.bf16 %v255_v23, %v253_v27  ;;  %v197_v34 = vadd.f32 %v196_v24, %v1328_v51 }
  0xe2   :  { %v198_v28 = vpop.f32.mrf.mxu0 }
  0xe3   :  { %v282_v29 = vpack.c.bf16 %v256_v26, %v254_v25  ;;  %v199_v32 = vadd.f32 %v198_v28, %v1324_v50  ;;  %v257_v41 = vmax.f32 %v197_v34, 0.0 }
  0xe4   :  { %v200_v31 = vpop.f32.mrf.mxu0 }
  0xe5   :  { %v201_v33 = vadd.f32 %v200_v31, %v1328_v51  ;;  %549 = vmatprep.mubr.bf16.mxu0 %v282_v29  ;;  %v258_v39 = vmax.f32 %v199_v32, 0.0 }
  0xe6   :  { %v202_v35 = vpop.f32.mrf.mxu0  ;;  %550 = vmatmul.mubr.bf16.gmra.mxu0 %v281_v30 }
  0xe7   :  { %v203_v36 = vadd.f32 %v202_v35, %v1324_v50  ;;  %v259_v37 = vmax.f32 %v201_v33, 0.0 }
  0xe8   :  { %v206_v38 = vpop.f32.mrf.mxu0 }
  0xe9   :  { %v260_v40 = vmax.f32 %v203_v36, 0.0  ;;  %v283_v44 = vpack.c.bf16 %v259_v37, %v257_v41  ;;  %v207_v53 = vadd.f32 %v206_v38, %v1328_v51 }
  0xea   :  { %v208_v42 = vpop.f32.mrf.mxu0 }
  0xeb   :  { %v284_v43 = vpack.c.bf16 %v260_v40, %v258_v39  ;;  %v209_v49 = vadd.f32 %v208_v42, %v1324_v50  ;;  %v261_v60 = vmax.f32 %v207_v53, 0.0  ;;  %v325_v40 = vld [vmem:[%s1652_s4] sm:$0x3]  ;;  %s1143_s4 = smov [#allocation2]  }
  0xec   :  { %v210_v48 = vpop.f32.mrf.mxu0  ;;  %v1367_v41 = vrot.slane %v325_v40, %v43_v47  ;;  %s903_s23 = sshll.u32 %s1143_s4, 4  ;;  %s904_s23 = int_to_ptr.vmem [resolvable:$true] %s903_s23 }
  0xed   :  { %v211_v52 = vadd.f32 %v210_v48, %v1328_v51  ;;  %559 = vmatprep.mubr.bf16.mxu1 %v284_v43  ;;  %v262_v58 = vmax.f32 %v209_v49, 0.0  ;;  %s1120_s1 = scalar_lea.vmem %s904_s23, 4096  ;;  %p1125_p1 = scmp.lt.s32.totalorder %s904_s23, %s904_s23 }
  0xee   :  { %v212_v54 = vpop.f32.mrf.mxu0  ;;  %560 = vmatmul.mubr.bf16.vlgmr.msra.gmra.mxu1 %v283_v44  ;;  %p1121_p0 = scmp.ne.s32.totalorder %s904_s23, %s1120_s1  ;;  %p1126_p2 = scmp.lt.s32.totalorder %s1120_s1, %s1120_s1 }
  0xef   :  { %v213_v55 = vadd.f32 %v212_v54, %v1324_v50  ;;  %v263_v56 = vmax.f32 %v211_v52, 0.0 }
  0xf0   :  { %v216_v57 = vpop.f32.mrf.mxu0  ;;  %p1127_p3 = por %p1126_p2, %p1125_p1 }
  0xf1   :  { %v264_v59 = vmax.f32 %v213_v55, 0.0  ;;  %v285_v63 = vpack.c.bf16 %v263_v56, %v261_v60  ;;  %v217_v3 = vadd.f32 %v216_v57, %v1328_v51 }
  0xf2   :  { %v218_v61 = vpop.f32.mrf.mxu0  ;;  %p1128_p4 = pnand %p1127_p3, %p1121_p0 }
  0xf3   :  { %v286_v62 = vpack.c.bf16 %v264_v59, %v262_v58  ;;  %v219_v1 = vadd.f32 %v218_v61, %v1324_v50  ;;  %v265_v10 = vmax.f32 %v217_v3, 0.0 }
  0xf4   :  { %v220_v0 = vpop.f32.mrf.mxu0 }
  0xf5   :  { %v221_v2 = vadd.f32 %v220_v0, %v1328_v51  ;;  %569 = vmatprep.mubr.bf16.mxu1 %v286_v62  ;;  %v266_v8 = vmax.f32 %v219_v1, 0.0 }
  0xf6   :  { %v222_v4 = vpop.f32.mrf.mxu0  ;;  %570 = vmatmul.mubr.bf16.gmra.mxu1 %v285_v63 }
  0xf7   :  { %v223_v5 = vadd.f32 %v222_v4, %v1324_v50  ;;  %v267_v6 = vmax.f32 %v221_v2, 0.0 }
  0xf8   :  { %v226_v7 = vpop.f32.mrf.mxu0 }
  0xf9   :  { %v268_v9 = vmax.f32 %v223_v5, 0.0  ;;  %v287_v13 = vpack.c.bf16 %v267_v6, %v265_v10  ;;  %v227_v17 = vadd.f32 %v226_v7, %v1328_v51 }
  0xfa   :  { %v228_v11 = vpop.f32.mrf.mxu0 }
  0xfb   :  { %v288_v12 = vpack.c.bf16 %v268_v9, %v266_v8  ;;  %v229_v15 = vadd.f32 %v228_v11, %v1324_v50  ;;  %v269_v24 = vmax.f32 %v227_v17, 0.0 }
  0xfc   :  { %v230_v14 = vpop.f32.mrf.mxu0 }
  0xfd   :  { %v231_v16 = vadd.f32 %v230_v14, %v1328_v51  ;;  %579 = vmatprep.mubr.bf16.mxu1 %v288_v12  ;;  %v270_v22 = vmax.f32 %v229_v15, 0.0 }
  0xfe   :  { %v232_v18 = vpop.f32.mrf.mxu0  ;;  %580 = vmatmul.mubr.bf16.gmra.mxu1 %v287_v13 }
  0xff   :  { %v233_v19 = vadd.f32 %v232_v18, %v1324_v50  ;;  %v271_v20 = vmax.f32 %v231_v16, 0.0 }
 0x100   :  { %v236_v21 = vpop.f32.mrf.mxu0 }
 0x101   :  { %v272_v23 = vmax.f32 %v233_v19, 0.0  ;;  %v289_v27 = vpack.c.bf16 %v271_v20, %v269_v24  ;;  %v237_v31 = vadd.f32 %v236_v21, %v1328_v51 }
 0x102   :  { %v238_v25 = vpop.f32.mrf.mxu0 }
 0x103   :  { %v290_v26 = vpack.c.bf16 %v272_v23, %v270_v22  ;;  %v239_v29 = vadd.f32 %v238_v25, %v1324_v50  ;;  %v273_v37 = vmax.f32 %v237_v31, 0.0 }
 0x104   :  { %v240_v28 = vpop.f32.mrf.mxu0 }
 0x105   :  { %v241_v30 = vadd.f32 %v240_v28, %v1328_v51  ;;  %589 = vmatprep.mubr.bf16.mxu1 %v290_v26  ;;  %v274_v35 = vmax.f32 %v239_v29, 0.0  ;;  %v1371_v51 = vrot.slane %v325_v40, %v47_v46 }
 0x106   :  { %v242_v32 = vpop.f32.mrf.mxu0  ;;  %590 = vmatmul.mubr.bf16.gmra.mxu1 %v289_v27 }
 0x107   :  { %v243_v33 = vadd.f32 %v242_v32, %v1324_v50  ;;  %v275_v34 = vmax.f32 %v241_v30, 0.0 }
 0x109   :  { %v276_v36 = vmax.f32 %v243_v33, 0.0  ;;  %v291_v39 = vpack.c.bf16 %v275_v34, %v273_v37 }
 0x10b   :  { %v292_v38 = vpack.c.bf16 %v276_v36, %v274_v35 }
 0x10d   :  { %599 = vmatprep.mubr.bf16.mxu1 %v292_v38 }
 0x10e   :  { %600 = vmatmul.mubr.bf16.gmra.mxu1 %v291_v39 }
 0x196   :  { %v531_v50 = vpop.f32.mrf.mxu0 }
 0x197   :  { %v1374_v42 = vadd.f32 %v531_v50, %v1367_v41 }
 0x198   :  { %v533_v43 = vpop.f32.mrf.mxu0 }
 0x199   :  { %v1377_v44 = vadd.f32 %v533_v43, %v1371_v51  ;;  %v610_v47 = vmul.f32 %v1374_v42, %v1374_v42 }
 0x19a   :  { %v535_v48 = vpop.f32.mrf.mxu0 }
 0x19b   :  { %v1380_v49 = vadd.f32 %v535_v48, %v1367_v41  ;;  %v611_v45 = vmul.f32 %v1377_v44, %v1377_v44 }
 0x19c   :  { %v537_v46 = vpop.f32.mrf.mxu0 }
 0x19d   :  { %v1387_v52 = vadd.f32 %v537_v46, %v1371_v51  ;;  %v642_v53 = vadd.f32 %v611_v45, %v610_v47  ;;  %v612_v55 = vmul.f32 %v1380_v49, %v1380_v49 }
 0x19e   :  { %v541_v54 = vpop.f32.mrf.mxu0 }
 0x19f   :  { %v613_v56 = vmul.f32 %v1387_v52, %v1387_v52  ;;  %v1394_v57 = vadd.f32 %v541_v54, %v1367_v41  ;;  %643 = vadd.xlane.f32.xlu0 %v642_v53 }
 0x1a0   :  { %v543_v58 = vpop.f32.mrf.mxu0 }
 0x1a1   :  { %v1397_v59 = vadd.f32 %v543_v58, %v1371_v51  ;;  %v645_v60 = vadd.f32 %v613_v56, %v612_v55  ;;  %v614_v63 = vmul.f32 %v1394_v57, %v1394_v57 }
 0x1a2   :  { %v545_v61 = vpop.f32.mrf.mxu0 }
 0x1a3   :  { %v1400_v62 = vadd.f32 %v545_v61, %v1367_v41  ;;  %646 = vadd.xlane.f32.xlu0 %v645_v60  ;;  %v615_v0 = vmul.f32 %v1397_v59, %v1397_v59 }
 0x1a4   :  { %v547_v1 = vpop.f32.mrf.mxu0 }
 0x1a5   :  { %v1407_v2 = vadd.f32 %v547_v1, %v1371_v51  ;;  %v648_v3 = vadd.f32 %v615_v0, %v614_v63  ;;  %v616_v5 = vmul.f32 %v1400_v62, %v1400_v62 }
 0x1a6   :  { %v551_v4 = vpop.f32.mrf.mxu0 }
 0x1a7   :  { %v617_v6 = vmul.f32 %v1407_v2, %v1407_v2  ;;  %v1414_v7 = vadd.f32 %v551_v4, %v1367_v41  ;;  %649 = vadd.xlane.f32.xlu1 %v648_v3 }
 0x1a8   :  { %v553_v8 = vpop.f32.mrf.mxu0 }
 0x1a9   :  { %v1417_v9 = vadd.f32 %v553_v8, %v1371_v51  ;;  %v651_v10 = vadd.f32 %v617_v6, %v616_v5  ;;  %v618_v12 = vmul.f32 %v1414_v7, %v1414_v7 }
 0x1aa   :  { %v555_v11 = vpop.f32.mrf.mxu0 }
 0x1ab   :  { %v619_v13 = vmul.f32 %v1417_v9, %v1417_v9  ;;  %v1424_v14 = vadd.f32 %v555_v11, %v1367_v41  ;;  %652 = vadd.xlane.f32.xlu1 %v651_v10 }
 0x1ac   :  { %v557_v15 = vpop.f32.mrf.mxu0 }
 0x1ad   :  { %v1427_v16 = vadd.f32 %v557_v15, %v1371_v51  ;;  %v654_v17 = vadd.f32 %v619_v13, %v618_v12  ;;  %v620_v19 = vmul.f32 %v1424_v14, %v1424_v14 }
 0x1ae   :  { %v561_v18 = vpop.f32.mrf.mxu1 }
 0x1af   :  { %v621_v20 = vmul.f32 %v1427_v16, %v1427_v16  ;;  %v1434_v21 = vadd.f32 %v561_v18, %v1367_v41  ;;  %655 = vadd.xlane.f32.xlu0 %v654_v17 }
 0x1b0   :  { %v563_v22 = vpop.f32.mrf.mxu1 }
 0x1b1   :  { %v1437_v23 = vadd.f32 %v563_v22, %v1371_v51  ;;  %v657_v24 = vadd.f32 %v621_v20, %v620_v19  ;;  %v622_v26 = vmul.f32 %v1434_v21, %v1434_v21 }
 0x1b2   :  { %v565_v25 = vpop.f32.mrf.mxu1 }
 0x1b3   :  { %v623_v27 = vmul.f32 %v1437_v23, %v1437_v23  ;;  %v1444_v28 = vadd.f32 %v565_v25, %v1367_v41  ;;  %658 = vadd.xlane.f32.xlu1 %v657_v24 }
 0x1b4   :  { %v567_v29 = vpop.f32.mrf.mxu1 }
 0x1b5   :  { %v1447_v30 = vadd.f32 %v567_v29, %v1371_v51  ;;  %v660_v31 = vadd.f32 %v623_v27, %v622_v26  ;;  %v624_v33 = vmul.f32 %v1444_v28, %v1444_v28 }
 0x1b6   :  { %v571_v32 = vpop.f32.mrf.mxu1 }
 0x1b7   :  { %v625_v34 = vmul.f32 %v1447_v30, %v1447_v30  ;;  %v1454_v35 = vadd.f32 %v571_v32, %v1367_v41  ;;  %661 = vadd.xlane.f32.xlu0 %v660_v31 }
 0x1b8   :  { %v573_v36 = vpop.f32.mrf.mxu1 }
 0x1b9   :  { %v1457_v37 = vadd.f32 %v573_v36, %v1371_v51  ;;  %v663_v38 = vadd.f32 %v625_v34, %v624_v33  ;;  %v626_v40 = vmul.f32 %v1454_v35, %v1454_v35 }
 0x1ba   :  { %v575_v39 = vpop.f32.mrf.mxu1 }
 0x1bb   :  { %v627_v50 = vmul.f32 %v1457_v37, %v1457_v37  ;;  %v1464_v43 = vadd.f32 %v575_v39, %v1367_v41  ;;  %664 = vadd.xlane.f32.xlu1 %v663_v38 }
 0x1bc   :  { %v577_v48 = vpop.f32.mrf.mxu1 }
 0x1bd   :  { %v1467_v47 = vadd.f32 %v577_v48, %v1371_v51  ;;  %v666_v45 = vadd.f32 %v627_v50, %v626_v40  ;;  %v628_v53 = vmul.f32 %v1464_v43, %v1464_v43 }
 0x1be   :  { %v581_v46 = vpop.f32.mrf.mxu1 }
 0x1bf   :  { %v629_v54 = vmul.f32 %v1467_v47, %v1467_v47  ;;  %v1474_v55 = vadd.f32 %v581_v46, %v1367_v41  ;;  %667 = vadd.xlane.f32.xlu0 %v666_v45 }
 0x1c0   :  { %v583_v56 = vpop.f32.mrf.mxu1 }
 0x1c1   :  { %v1477_v58 = vadd.f32 %v583_v56, %v1371_v51  ;;  %v669_v60 = vadd.f32 %v629_v54, %v628_v53  ;;  %v630_v63 = vmul.f32 %v1474_v55, %v1474_v55 }
 0x1c2   :  { %v585_v61 = vpop.f32.mrf.mxu1 }
 0x1c3   :  { %v631_v0 = vmul.f32 %v1477_v58, %v1477_v58  ;;  %v1484_v1 = vadd.f32 %v585_v61, %v1367_v41  ;;  %670 = vadd.xlane.f32.xlu1 %v669_v60 }
 0x1c4   :  { %v587_v3 = vpop.f32.mrf.mxu1 }
 0x1c5   :  { %v1487_v4 = vadd.f32 %v587_v3, %v1371_v51  ;;  %v672_v5 = vadd.f32 %v631_v0, %v630_v63  ;;  %v632_v8 = vmul.f32 %v1484_v1, %v1484_v1 }
 0x1c6   :  { %v591_v6 = vpop.f32.mrf.mxu1 }
 0x1c7   :  { %v633_v10 = vmul.f32 %v1487_v4, %v1487_v4  ;;  %v1494_v11 = vadd.f32 %v591_v6, %v1367_v41  ;;  %673 = vadd.xlane.f32.xlu0 %v672_v5 }
 0x1c8   :  { %v593_v12 = vpop.f32.mrf.mxu1 }
 0x1c9   :  { %v1497_v13 = vadd.f32 %v593_v12, %v1371_v51  ;;  %v675_v15 = vadd.f32 %v633_v10, %v632_v8  ;;  %v634_v18 = vmul.f32 %v1494_v11, %v1494_v11 }
 0x1ca   :  { %v595_v17 = vpop.f32.mrf.mxu1 }
 0x1cb   :  { %v635_v19 = vmul.f32 %v1497_v13, %v1497_v13  ;;  %v1504_v20 = vadd.f32 %v595_v17, %v1367_v41  ;;  %676 = vadd.xlane.f32.xlu1 %v675_v15 }
 0x1cc   :  { %v597_v22 = vpop.f32.mrf.mxu1 }
 0x1cd   :  { %v1507_v24 = vadd.f32 %v597_v22, %v1371_v51  ;;  %v678_v25 = vadd.f32 %v635_v19, %v634_v18  ;;  %v636_v27 = vmul.f32 %v1504_v20, %v1504_v20 }
 0x1ce   :  { %v601_v26 = vpop.f32.mrf.mxu1 }
 0x1cf   :  { %v637_v29 = vmul.f32 %v1507_v24, %v1507_v24  ;;  %v1514_v31 = vadd.f32 %v601_v26, %v1367_v41  ;;  %679 = vadd.xlane.f32.xlu0 %v678_v25 }
 0x1d0   :  { %v603_v32 = vpop.f32.mrf.mxu1 }
 0x1d1   :  { %v1517_v33 = vadd.f32 %v603_v32, %v1371_v51  ;;  %v681_v34 = vadd.f32 %v637_v29, %v636_v27  ;;  %v638_v38 = vmul.f32 %v1514_v31, %v1514_v31 }
 0x1d2   :  { %v605_v36 = vpop.f32.mrf.mxu1 }
 0x1d3   :  { %v639_v39 = vmul.f32 %v1517_v33, %v1517_v33  ;;  %v1524_v40 = vadd.f32 %v605_v36, %v1367_v41  ;;  %682 = vadd.xlane.f32.xlu1 %v681_v34 }
 0x1d4   :  { %v607_v50 = vpop.f32.mrf.mxu1 }
 0x1d5   :  { %v1527_v48 = vadd.f32 %v607_v50, %v1371_v51  ;;  %v684_v45 = vadd.f32 %v639_v39, %v638_v38  ;;  %v640_v46 = vmul.f32 %v1524_v40, %v1524_v40 }
 0x1d7   :  { %v641_v53 = vmul.f32 %v1527_v48, %v1527_v48  ;;  %685 = vadd.xlane.f32.xlu0 %v684_v45 }
 0x1d9   :  { %v687_v54 = vadd.f32 %v641_v53, %v640_v46 }
 0x1db   :  { %688 = vadd.xlane.f32.xlu1 %v687_v54 }
 0x228   :  { %v644_v56 = vpop.xlane.xlu0 %643 }
 0x229   :  { %1056 = vrsqrt.f32 %v644_v56  ;;  %vm692_vm2 = vcmp.eq.f32.partialorder %v644_v56, inf  ;;  %v695_v0 = vand.u32 2147483648, %v644_v56  ;;  %vm694_vm3 = vcmp.eq.f32.partialorder %v644_v56, 0.0 }
 0x22c   :  { %v647_v60 = vpop.xlane.xlu0 %646 }
 0x22d   :  { %1058 = vrsqrt.f32 %v647_v60  ;;  %vm699_vm4 = vcmp.eq.f32.partialorder %v647_v60, inf  ;;  %v702_v15 = vand.u32 2147483648, %v647_v60  ;;  %vm701_vm5 = vcmp.eq.f32.partialorder %v647_v60, 0.0 }
 0x230   :  { %v650_v41 = vpop.xlane.xlu1 %649 }
 0x231   :  { %1060 = vrsqrt.f32 %v650_v41  ;;  %vm706_vm6 = vcmp.eq.f32.partialorder %v650_v41, inf  ;;  %v709_v27 = vand.u32 2147483648, %v650_v41  ;;  %vm708_vm7 = vcmp.eq.f32.partialorder %v650_v41, 0.0 }
 0x234   :  { %v653_v61 = vpop.xlane.xlu1 %652 }
 0x235   :  { %1062 = vrsqrt.f32 %v653_v61  ;;  %vm713_vm8 = vcmp.eq.f32.partialorder %v653_v61, inf  ;;  %v716_v50 = vand.u32 2147483648, %v653_v61  ;;  %vm715_vm9 = vcmp.eq.f32.partialorder %v653_v61, 0.0 }
 0x236   :  { %v1057_v51 = vpop.eup %1056 }
 0x237   :  { %v691_v63 = vmul.f32 %v1057_v51, %v644_v56 }
 0x238   :  { %v656_v3 = vpop.xlane.xlu0 %655 }
 0x239   :  { %v693_v5 = vsel %vm692_vm2, %v644_v56, %v691_v63  ;;  %1064 = vrsqrt.f32 %v656_v3  ;;  %vm720_vm10 = vcmp.eq.f32.partialorder %v656_v3, inf  ;;  %vm722_vm11 = vcmp.eq.f32.partialorder %v656_v3, 0.0 }
 0x23a   :  { %v1059_v6 = vpop.eup %1058  ;;  %v696_v8 = vsel %vm694_vm3, %v695_v0, %v693_v5 }
 0x23b   :  { %v802_v10 = vadd.f32 1e-07, %v696_v8  ;;  %v698_v12 = vmul.f32 %v1059_v6, %v647_v60 }
 0x23c   :  { %v659_v17 = vpop.xlane.xlu1 %658 }
 0x23d   :  { %1066 = vrcp.f32 %v802_v10  ;;  %v700_v18 = vsel %vm699_vm4, %v647_v60, %v698_v12  ;;  %vm727_vm12 = vcmp.eq.f32.partialorder %v659_v17, inf  ;;  %vm729_vm13 = vcmp.eq.f32.partialorder %v659_v17, 0.0 }
 0x23e   :  { %v1061_v19 = vpop.eup %1060  ;;  %v703_v22 = vsel %vm701_vm5, %v702_v15, %v700_v18  ;;  %1068 = vrsqrt.f32 %v659_v17  ;;  %v730_v18 = vand.u32 2147483648, %v659_v17 }
 0x23f   :  { %v803_v25 = vadd.f32 1e-07, %v703_v22  ;;  %v705_v26 = vmul.f32 %v1061_v19, %v650_v41 }
 0x240   :  { %v1533_v29 = vpop.xlane.xlu0 %661 }
 0x241   :  { %1070 = vrcp.f32 %v803_v25  ;;  %v707_v32 = vsel %vm706_vm6, %v650_v41, %v705_v26  ;;  %v723_v41 = vand.u32 2147483648, %v656_v3  ;;  %vm734_vm14 = vcmp.eq.f32.partialorder %v1533_v29, inf }
 0x242   :  { %v1063_v34 = vpop.eup %1062  ;;  %v710_v36 = vsel %vm708_vm7, %v709_v27, %v707_v32  ;;  %1072 = vrsqrt.f32 %v1533_v29  ;;  %vm736_vm15 = vcmp.eq.f32.partialorder %v1533_v29, 0.0 }
 0x243   :  { %v804_v38 = vadd.f32 1e-07, %v710_v36  ;;  %v712_v39 = vmul.f32 %v1063_v34, %v653_v61  ;;  %v737_v34 = vand.u32 2147483648, %v1533_v29 }
 0x244   :  { %v1536_v45 = vpop.xlane.xlu1 %664 }
 0x245   :  { %1074 = vrcp.f32 %v804_v38  ;;  %v714_v46 = vsel %vm713_vm8, %v653_v61, %v712_v39  ;;  %vm741_vm0 = vcmp.eq.f32.partialorder %v1536_v45, inf  ;;  %vm743_vm1 = vcmp.eq.f32.partialorder %v1536_v45, 0.0 }
 0x246   :  { %v1065_v53 = vpop.eup %1064  ;;  %v717_v54 = vsel %vm715_vm9, %v716_v50, %v714_v46  ;;  %1076 = vrsqrt.f32 %v1536_v45 }
 0x247   :  { %v805_v56 = vadd.f32 1e-07, %v717_v54  ;;  %v719_v60 = vmul.f32 %v1065_v53, %v656_v3  ;;  %v744_v54 = vand.u32 2147483648, %v1536_v45 }
 0x248   :  { %v1539_v51 = vpop.xlane.xlu0 %667 }
 0x249   :  { %1078 = vrcp.f32 %v805_v56  ;;  %v721_v63 = vsel %vm720_vm10, %v656_v3, %v719_v60  ;;  %vm748_vm2 = vcmp.eq.f32.partialorder %v1539_v51, inf  ;;  %vm750_vm3 = vcmp.eq.f32.partialorder %v1539_v51, 0.0 }
 0x24a   :  { %v1067_v0 = vpop.eup %1066  ;;  %v724_v5 = vsel %vm722_vm11, %v723_v41, %v721_v63  ;;  %1080 = vrsqrt.f32 %v1539_v51 }
 0x24b   :  { %v1069_v6 = vpop.eup %1068  ;;  %v834_v61 = vmul.f32 %v1067_v0, %v1374_v42  ;;  %v835_v8 = vmul.f32 %v1067_v0, %v1377_v44  ;;  %v806_v10 = vadd.f32 1e-07, %v724_v5 }
 0x24c   :  { %v726_v12 = vmul.f32 %v1069_v6, %v659_v17  ;;  %v1544_v15 = vpop.xlane.xlu1 %670  ;;  %v751_v6 = vand.u32 2147483648, %v1539_v51 }
 0x24d   :  { %866 = vst [vmem:[#allocation2] sm:$0xff] %v834_v61  ;;  %867 = vst [vmem:[#allocation2 + $0x8] sm:$0xff] %v835_v8  ;;  %1082 = vrcp.f32 %v806_v10  ;;  %vm755_vm4 = vcmp.eq.f32.partialorder %v1544_v15, inf  ;;  %vm757_vm5 = vcmp.eq.f32.partialorder %v1544_v15, 0.0 }
 0x24e   :  { %v1071_v19 = vpop.eup %1070  ;;  %v728_v3 = vsel %vm727_vm12, %v659_v17, %v726_v12  ;;  %1084 = vrsqrt.f32 %v1544_v15 }
 0x24f   :  { %v1073_v22 = vpop.eup %1072  ;;  %v836_v25 = vmul.f32 %v1071_v19, %v1380_v49  ;;  %v837_v42 = vmul.f32 %v1071_v19, %v1387_v52  ;;  %v731_v44 = vsel %vm729_vm13, %v730_v18, %v728_v3  ;;  %v758_v3 = vand.u32 2147483648, %v1544_v15 }
 0x250   :  { %v807_v26 = vadd.f32 1e-07, %v731_v44  ;;  %v733_v27 = vmul.f32 %v1073_v22, %v1533_v29  ;;  %v1550_v32 = vpop.xlane.xlu0 %673 }
 0x251   :  { %868 = vst [vmem:[#allocation2 + $0x10] sm:$0xff] %v836_v25  ;;  %869 = vst [vmem:[#allocation2 + $0x18] sm:$0xff] %v837_v42  ;;  %1086 = vrsqrt.f32 %v1550_v32  ;;  %vm762_vm6 = vcmp.eq.f32.partialorder %v1550_v32, inf  ;;  %vm764_vm7 = vcmp.eq.f32.partialorder %v1550_v32, 0.0 }
 0x252   :  { %v1075_v17 = vpop.eup %1074  ;;  %1088 = vrcp.f32 %v807_v26  ;;  %v735_v49 = vsel %vm734_vm14, %v1533_v29, %v733_v27  ;;  %v765_v27 = vand.u32 2147483648, %v1550_v32 }
 0x253   :  { %v1077_v52 = vpop.eup %1076  ;;  %v838_v36 = vmul.f32 %v1075_v17, %v1394_v57  ;;  %v839_v38 = vmul.f32 %v1075_v17, %v1397_v59  ;;  %v738_v39 = vsel %vm736_vm15, %v737_v34, %v735_v49 }
 0x254   :  { %v808_v50 = vadd.f32 1e-07, %v738_v39  ;;  %v740_v46 = vmul.f32 %v1077_v52, %v1536_v45  ;;  %v1560_v53 = vpop.xlane.xlu1 %676 }
 0x255   :  { %870 = vst [vmem:[#allocation2 + $0x20] sm:$0xff] %v838_v36  ;;  %871 = vst [vmem:[#allocation2 + $0x28] sm:$0xff] %v839_v38  ;;  %1090 = vrsqrt.f32 %v1560_v53  ;;  %vm769_vm8 = vcmp.eq.f32.partialorder %v1560_v53, inf  ;;  %v772_v39 = vand.u32 2147483648, %v1560_v53  ;;  %vm771_vm9 = vcmp.eq.f32.partialorder %v1560_v53, 0.0 }
 0x256   :  { %v1079_v29 = vpop.eup %1078  ;;  %1092 = vrcp.f32 %v808_v50  ;;  %v742_v57 = vsel %vm741_vm0, %v1536_v45, %v740_v46 }
 0x257   :  { %v1081_v59 = vpop.eup %1080  ;;  %v840_v56 = vmul.f32 %v1079_v29, %v1400_v62  ;;  %v841_v60 = vmul.f32 %v1079_v29, %v1407_v2  ;;  %v745_v41 = vsel %vm743_vm1, %v744_v54, %v742_v57 }
 0x258   :  { %v809_v63 = vadd.f32 1e-07, %v745_v41  ;;  %v747_v0 = vmul.f32 %v1081_v59, %v1539_v51  ;;  %v1570_v5 = vpop.xlane.xlu0 %679 }
 0x259   :  { %872 = vst [vmem:[#allocation2 + $0x30] sm:$0xff] %v840_v56  ;;  %873 = vst [vmem:[#allocation2 + $0x38] sm:$0xff] %v841_v60  ;;  %1094 = vrsqrt.f32 %v1570_v5  ;;  %vm776_vm10 = vcmp.eq.f32.partialorder %v1570_v5, inf  ;;  %v779_v56 = vand.u32 2147483648, %v1570_v5  ;;  %vm778_vm11 = vcmp.eq.f32.partialorder %v1570_v5, 0.0 }
 0x25a   :  { %v1083_v45 = vpop.eup %1082  ;;  %1096 = vrcp.f32 %v809_v63  ;;  %v749_v62 = vsel %vm748_vm2, %v1539_v51, %v747_v0 }
 0x25b   :  { %v1085_v2 = vpop.eup %1084  ;;  %v842_v61 = vmul.f32 %v1083_v45, %v1414_v7  ;;  %v843_v8 = vmul.f32 %v1083_v45, %v1417_v9  ;;  %v752_v10 = vsel %vm750_vm3, %v751_v6, %v749_v62 }
 0x25c   :  { %v810_v12 = vadd.f32 1e-07, %v752_v10  ;;  %v754_v18 = vmul.f32 %v1085_v2, %v1544_v15  ;;  %v1580_v19 = vpop.xlane.xlu1 %682 }
 0x25d   :  { %874 = vst [vmem:[#allocation2 + $0x40] sm:$0xff] %v842_v61  ;;  %875 = vst [vmem:[#allocation2 + $0x48] sm:$0xff] %v843_v8  ;;  %1098 = vrsqrt.f32 %v1580_v19  ;;  %vm783_vm12 = vcmp.eq.f32.partialorder %v1580_v19, inf  ;;  %v786_v45 = vand.u32 2147483648, %v1580_v19  ;;  %vm785_vm13 = vcmp.eq.f32.partialorder %v1580_v19, 0.0 }
 0x25e   :  { %v1087_v51 = vpop.eup %1086  ;;  %1100 = vrcp.f32 %v810_v12  ;;  %v756_v7 = vsel %vm755_vm4, %v1544_v15, %v754_v18 }
 0x25f   :  { %v1089_v9 = vpop.eup %1088  ;;  %v759_v22 = vsel %vm757_vm5, %v758_v3, %v756_v7  ;;  %v761_v25 = vmul.f32 %v1087_v51, %v1550_v32 }
 0x260   :  { %v844_v42 = vmul.f32 %v1089_v9, %v1424_v14  ;;  %v845_v44 = vmul.f32 %v1089_v9, %v1427_v16  ;;  %v811_v26 = vadd.f32 1e-07, %v759_v22  ;;  %v1592_v34 = vpop.xlane.xlu0 %685 }
 0x261   :  { %v763_v17 = vsel %vm762_vm6, %v1550_v32, %v761_v25  ;;  %1102 = vrsqrt.f32 %v1592_v34  ;;  %vm790_vm14 = vcmp.eq.f32.partialorder %v1592_v34, inf  ;;  %v793_v12 = vand.u32 2147483648, %v1592_v34 }
 0x262   :  { %v1091_v15 = vpop.eup %1090  ;;  %876 = vst [vmem:[#allocation2 + $0x50] sm:$0xff] %v844_v42  ;;  %877 = vst [vmem:[#allocation2 + $0x58] sm:$0xff] %v845_v44  ;;  %1104 = vrcp.f32 %v811_v26  ;;  %v766_v49 = vsel %vm764_vm7, %v765_v27, %v763_v17  ;;  %vm792_vm15 = vcmp.eq.f32.partialorder %v1592_v34, 0.0 }
 0x263   :  { %v1093_v52 = vpop.eup %1092  ;;  %v812_v14 = vadd.f32 1e-07, %v766_v49  ;;  %v768_v16 = vmul.f32 %v1091_v15, %v1560_v53 }
 0x264   :  { %v846_v36 = vmul.f32 %v1093_v52, %v1434_v21  ;;  %v847_v38 = vmul.f32 %v1093_v52, %v1437_v23  ;;  %v1602_v32 = vpop.xlane.xlu1 %688 }
 0x265   :  { %1106 = vrcp.f32 %v812_v14  ;;  %v770_v50 = vsel %vm769_vm8, %v1560_v53, %v768_v16  ;;  %vm797_vm0 = vcmp.eq.f32.partialorder %v1602_v32, inf  ;;  %v800_v22 = vand.u32 2147483648, %v1602_v32 }
 0x266   :  { %v1095_v46 = vpop.eup %1094  ;;  %878 = vst [vmem:[#allocation2 + $0x60] sm:$0xff] %v846_v36  ;;  %879 = vst [vmem:[#allocation2 + $0x68] sm:$0xff] %v847_v38  ;;  %v773_v54 = vsel %vm771_vm9, %v772_v39, %v770_v50  ;;  %1108 = vrsqrt.f32 %v1602_v32  ;;  %vm799_vm1 = vcmp.eq.f32.partialorder %v1602_v32, 0.0 }
 0x267   :  { %v1097_v21 = vpop.eup %1096  ;;  %v813_v29 = vadd.f32 1e-07, %v773_v54  ;;  %v775_v23 = vmul.f32 %v1095_v46, %v1570_v5 }
 0x268   :  { %v848_v57 = vmul.f32 %v1097_v21, %v1444_v28  ;;  %v849_v59 = vmul.f32 %v1097_v21, %v1447_v30 }
 0x269   :  { %1110 = vrcp.f32 %v813_v29  ;;  %v777_v53 = vsel %vm776_vm10, %v1570_v5, %v775_v23 }
 0x26a   :  { %v1099_v60 = vpop.eup %1098  ;;  %880 = vst [vmem:[#allocation2 + $0x70] sm:$0xff] %v848_v57  ;;  %881 = vst [vmem:[#allocation2 + $0x78] sm:$0xff] %v849_v59  ;;  %v780_v41 = vsel %vm778_vm11, %v779_v56, %v777_v53 }
 0x26b   :  { %v1101_v63 = vpop.eup %1100  ;;  %v814_v0 = vadd.f32 1e-07, %v780_v41  ;;  %v782_v6 = vmul.f32 %v1099_v60, %v1580_v19 }
 0x26c   :  { %v850_v28 = vmul.f32 %v1101_v63, %v1454_v35  ;;  %v851_v30 = vmul.f32 %v1101_v63, %v1457_v37 }
 0x26d   :  { %1112 = vrcp.f32 %v814_v0  ;;  %v784_v62 = vsel %vm783_vm12, %v1580_v19, %v782_v6 }
 0x26e   :  { %v1103_v5 = vpop.eup %1102  ;;  %882 = vst [vmem:[#allocation2 + $0x80] sm:$0xff] %v850_v28  ;;  %883 = vst [vmem:[#allocation2 + $0x88] sm:$0xff] %v851_v30  ;;  %v787_v2 = vsel %vm785_vm13, %v786_v45, %v784_v62 }
 0x26f   :  { %v1105_v61 = vpop.eup %1104  ;;  %v815_v8 = vadd.f32 1e-07, %v787_v2  ;;  %v789_v10 = vmul.f32 %v1103_v5, %v1592_v34 }
 0x270   :  { %v852_v35 = vmul.f32 %v1105_v61, %v1464_v43  ;;  %v853_v37 = vmul.f32 %v1105_v61, %v1467_v47 }
 0x271   :  { %1114 = vrcp.f32 %v815_v8  ;;  %v791_v18 = vsel %vm790_vm14, %v1592_v34, %v789_v10 }
 0x272   :  { %v1107_v19 = vpop.eup %1106  ;;  %884 = vst [vmem:[#allocation2 + $0x90] sm:$0xff] %v852_v35  ;;  %885 = vst [vmem:[#allocation2 + $0x98] sm:$0xff] %v853_v37  ;;  %v794_v3 = vsel %vm792_vm15, %v793_v12, %v791_v18 }
 0x273   :  { %v1109_v51 = vpop.eup %1108  ;;  %v854_v7 = vmul.f32 %v1107_v19, %v1474_v55  ;;  %v855_v43 = vmul.f32 %v1107_v19, %v1477_v58  ;;  %v816_v9 = vadd.f32 1e-07, %v794_v3 }
 0x274   :  { %v796_v47 = vmul.f32 %v1109_v51, %v1602_v32 }
 0x275   :  { %886 = vst [vmem:[#allocation2 + $0xa0] sm:$0xff] %v854_v7  ;;  %887 = vst [vmem:[#allocation2 + $0xa8] sm:$0xff] %v855_v43  ;;  %1116 = vrcp.f32 %v816_v9 }
 0x276   :  { %v1111_v25 = vpop.eup %1110  ;;  %v798_v42 = vsel %vm797_vm0, %v1602_v32, %v796_v47 }
 0x277   :  { %v856_v44 = vmul.f32 %v1111_v25, %v1484_v1  ;;  %v857_v55 = vmul.f32 %v1111_v25, %v1487_v4  ;;  %v801_v58 = vsel %vm799_vm1, %v800_v22, %v798_v42 }
 0x278   :  { %v817_v26 = vadd.f32 1e-07, %v801_v58 }
 0x279   :  { %888 = vst [vmem:[#allocation2 + $0xb0] sm:$0xff] %v856_v44  ;;  %889 = vst [vmem:[#allocation2 + $0xb8] sm:$0xff] %v857_v55 }
 0x27a   :  { %v1113_v27 = vpop.eup %1112  ;;  %1118 = vrcp.f32 %v817_v26 }
 0x27b   :  { %v858_v34 = vmul.f32 %v1113_v27, %v1494_v11  ;;  %v859_v17 = vmul.f32 %v1113_v27, %v1497_v13 }
 0x27d   :  { %890 = vst [vmem:[#allocation2 + $0xc0] sm:$0xff] %v858_v34  ;;  %891 = vst [vmem:[#allocation2 + $0xc8] sm:$0xff] %v859_v17 }
 0x27e   :  { %v1115_v15 = vpop.eup %1114 }
 0x27f   :  { %v860_v49 = vmul.f32 %v1115_v15, %v1504_v20  ;;  %v861_v52 = vmul.f32 %v1115_v15, %v1507_v24 }
 0x281   :  { %892 = vst [vmem:[#allocation2 + $0xd0] sm:$0xff] %v860_v49  ;;  %893 = vst [vmem:[#allocation2 + $0xd8] sm:$0xff] %v861_v52 }
 0x282   :  { %v1117_v1 = vpop.eup %1116 }
 0x283   :  { %v862_v4 = vmul.f32 %v1117_v1, %v1514_v31  ;;  %v863_v14 = vmul.f32 %v1117_v1, %v1517_v33 }
 0x285   :  { %894 = vst [vmem:[#allocation2 + $0xe0] sm:$0xff] %v862_v4  ;;  %895 = vst [vmem:[#allocation2 + $0xe8] sm:$0xff] %v863_v14 }
 0x287   :  { %v1119_v11 = vpop.eup %1118 }
 0x288   :  { %v864_v13 = vmul.f32 %v1119_v11, %v1524_v40  ;;  %v865_v16 = vmul.f32 %v1119_v11, %v1527_v48 }
 0x28a   :  { %896 = vst [vmem:[#allocation2 + $0xf0] sm:$0xff] %v864_v13  ;;  %897 = vst [vmem:[#allocation2 + $0xf8] sm:$0xff] %v865_v16 }
 0x28b   :  { %1131 = shalt.err (!%p1128_p4)
}
 0x28c   :  { %s1144_s24 = smov 256   ;;  %s1145_s25 = smov 16  }
 0x28d   :  { %909 = dma.vmem_to_hbm [thread:$0]  %s904_s23, 4096, %s1653_s5, [#allocation3], %s1144_s24, %s1144_s24, %s1145_s25  }
 0x28e   :  { %1140 = dma.done.wait [#allocation3], 4096  }
 0x28f   :  { %1141 = vsyncadd [#allocation3], 4294963200 }
 0x290   :  { %913 = vsyncpa [#allocation3], 1 }

</bundles_post_ra>
